<compile_context>
chip_gen: v5e
topology: v5e:2x2
jax: 0.10.0
libtpu: 0.0.40
codegen_flags: <defaults>
</compile_context>

<pallas_src>
import jax
import jax.numpy as jnp
from jax.experimental import pallas as pl
from jax.experimental.pallas import tpu as pltpu

BN_EPS = 0.8
LANE = 128  # TPU lane width; pad feature dims to multiples of this


def _round_up(n, m):
    return ((n + m - 1) // m) * m


def encoder_kernel(x_ref, w1_ref, vecs_ref, wh_ref, mean_ref, logvar_ref):
    hp = w1_ref.shape[1]          # padded hidden width
    lp = mean_ref.shape[-1]       # padded latent width (per head)
    out_w = wh_ref.shape[1]       # 2 * lp

    # ---- hidden = tanh(x @ W1 + b1) ------------------------------------
    x = x_ref[...]                                   # (B, n_inputs)
    b1 = vecs_ref[0:1, :hp]                          # (1, Hp)
    gamma = vecs_ref[1:2, :hp]                       # (1, Hp)
    beta = vecs_ref[2:3, :hp]                        # (1, Hp)
    bh = vecs_ref[3:4, :out_w]                       # (1, 2Lp) fused head bias
    h = jnp.tanh(
        jnp.dot(x, w1_ref[...], preferred_element_type=jnp.float32) + b1
    )                                                # (B, Hp)

    # ---- BatchNorm1d (training mode, per-group batch stats, eps=0.8) ----
    # Single pass: var = E[h^2] - mu^2; epilogue is one mul + one add.
    mu = jnp.mean(h, axis=0, keepdims=True)          # (1, Hp)
    ex2 = jnp.mean(h * h, axis=0, keepdims=True)     # (1, Hp)
    var = ex2 - mu * mu
    scale = gamma * jax.lax.rsqrt(var + BN_EPS)      # (1, Hp)
    shift = beta - mu * scale                        # (1, Hp)
    h_norm = h * scale + shift                       # (B, Hp)

    # ---- fused heads: [mean | logvar] in one MXU pass --------------------
    out = (
        jnp.dot(h_norm, wh_ref[...], preferred_element_type=jnp.float32) + bh
    )                                                # (B, 2Lp)
    # Split at the 128-lane boundary -> two lane-dense stores.
    mean_ref[...] = out[:, :lp]
    logvar_ref[...] = out[:, lp:]


def encoder_forward(x, packed, latent_dim):
    """x: (B, n_inputs) or (G, B, n_inputs) f32, G independent batches.

    Returns (mean, logvar) with shape (B, latent_dim) / (G, B, latent_dim).
    BatchNorm statistics are computed independently per group, matching one
    module forward per group.
    """
    w1_p, vecs_p, wh_p = packed
    single = x.ndim == 2
    if single:
        x = x[None]
    g, b, n_in = x.shape
    hp = w1_p.shape[1]
    out_w = wh_p.shape[1]
    lp = out_w // 2

    flops = 2 * g * b * (n_in * hp + hp * out_w)
    transcendentals = g * b * hp
    bytes_accessed = 4 * (x.size + w1_p.size + vecs_p.size + wh_p.size
                          + 2 * g * b * lp)

    grid_spec = pltpu.PrefetchScalarGridSpec(
        num_scalar_prefetch=0,
        grid=(g,),
        in_specs=[
            # per-group activation tile (double-buffered by the pipeline)
            pl.BlockSpec((None, b, n_in), lambda i: (i, 0, 0)),
            # weights / packed vectors: same block every step -> VMEM-resident
            pl.BlockSpec((n_in, hp), lambda i: (0, 0)),
            pl.BlockSpec(vecs_p.shape, lambda i: (0, 0)),
            pl.BlockSpec((hp, out_w), lambda i: (0, 0)),
        ],
        out_specs=(
            pl.BlockSpec((None, b, lp), lambda i: (i, 0, 0)),
            pl.BlockSpec((None, b, lp), lambda i: (i, 0, 0)),
        ),
    )

    mean_p, logvar_p = pl.pallas_call(
        encoder_kernel,
        out_shape=(
            jax.ShapeDtypeStruct((g, b, lp), jnp.float32),
            jax.ShapeDtypeStruct((g, b, lp), jnp.float32),
        ),
        grid_spec=grid_spec,
        compiler_params=pltpu.CompilerParams(
            # Groups are independent -> legal to shard across v7x's 2 TCs.
            dimension_semantics=("parallel",),
            # NOTE: re-derive if B/hidden are scaled up (v7x has 64 MiB VMEM).
            vmem_limit_bytes=32 * 1024 * 1024,
        ),
        cost_estimate=pl.CostEstimate(
            flops=flops,
            transcendentals=transcendentals,
            bytes_accessed=bytes_accessed,
        ),
    )(x, w1_p, vecs_p, wh_p)

    # Heads are padded to their own 128-lane blocks -> slices start at lane 0.
    mean = mean_p[..., :latent_dim]
    logvar = logvar_p[..., :latent_dim]
    if single:
        mean, logvar = mean[0], logvar[0]
    return mean, logvar


def init_params(key, n_inputs, latent_dim, hidden_size):
    """PyTorch-style uniform(-1/sqrt(fan_in), +1/sqrt(fan_in)) init."""
    ks = jax.random.split(key, 6)

    def lin(kw, kb, fan_in, fan_out):
        bound = 1.0 / jnp.sqrt(fan_in)
        # stored as (in, out) == PyTorch weight (out, in) transposed
        w = jax.random.uniform(kw, (fan_in, fan_out), jnp.float32, -bound, bound)
        b = jax.random.uniform(kb, (1, fan_out), jnp.float32, -bound, bound)
        return w, b

    w1, b1 = lin(ks[0], ks[1], n_inputs, hidden_size)
    wm, bm = lin(ks[2], ks[3], hidden_size, latent_dim)
    wv, bv = lin(ks[4], ks[5], hidden_size, latent_dim)
    gamma = jnp.ones((1, hidden_size), jnp.float32)   # BN weight init
    beta = jnp.zeros((1, hidden_size), jnp.float32)   # BN bias init
    return (w1, b1, gamma, beta, wm, bm, wv, bv)


def pack_params(params):
    """One-time repack: fuse heads, pack small vectors, pad to 128 lanes.

    Layout (all f32, zero-padded):
      w1_p : (n_inputs, Hp)
      vecs : (4, max(Hp, 2*Lp))  rows = [b1, gamma, beta, bh]
      wh_p : (Hp, 2*Lp)          cols = [wm | pad | wv | pad], each head Lp-wide
    """
    (w1, b1, gamma, beta, wm, bm, wv, bv) = params
    n_inputs, hidden = w1.shape
    latent = wm.shape[1]
    h_pad = _round_up(hidden, LANE)
    l_pad = _round_up(latent, LANE)
    out_w = 2 * l_pad
    vec_w = max(h_pad, out_w)

    # Linear-1 weight, hidden padded with zero columns.
    w1_p = jnp.zeros((n_inputs, h_pad), jnp.float32).at[:, :hidden].set(w1)

    # b1 / gamma / beta / fused-head bias packed into one small operand.
    vecs = jnp.zeros((4, vec_w), jnp.float32)
    vecs = vecs.at[0, :hidden].set(b1[0])
    vecs = vecs.at[1, :hidden].set(gamma[0])
    vecs = vecs.at[2, :hidden].set(beta[0])
    vecs = vecs.at[3, :latent].set(bm[0])
    vecs = vecs.at[3, l_pad:l_pad + latent].set(bv[0])

    # Fused heads, each padded to its own 128-lane block.
    wh_p = jnp.zeros((h_pad, out_w), jnp.float32)
    wh_p = wh_p.at[:hidden, :latent].set(wm)
    wh_p = wh_p.at[:hidden, l_pad:l_pad + latent].set(wv)

    return (w1_p, vecs, wh_p)


def encoder_reference(x, params):
    """Pure-JAX reference with identical semantics (unpadded params)."""
    (w1, b1, gamma, beta, wm, bm, wv, bv) = params
    h = jnp.tanh(x @ w1 + b1)
    mu = jnp.mean(h, axis=0, keepdims=True)
    var = jnp.mean((h - mu) ** 2, axis=0, keepdims=True)
    h = (h - mu) / jnp.sqrt(var + BN_EPS) * gamma + beta
    return h @ wm + bm, h @ wv + bv


if __name__ == "__main__":
    n_inputs, latent_dim, hidden_size = 32, 16, 64
    batch, groups = 8, 4

    key = jax.random.PRNGKey(0)
    k_x, k_p = jax.random.split(key)
    x_groups = jax.random.normal(k_x, (groups, batch, n_inputs), jnp.float32)
    params = init_params(k_p, n_inputs, latent_dim, hidden_size)
    packed = pack_params(params)
    packed = jax.block_until_ready(packed)  # one-time repack, off the hot path

    # Gridded path: several independent batches in one launch.
    mean_g, logvar_g = encoder_forward(x_groups, packed, latent_dim)
    jax.block_until_ready((mean_g, logvar_g))
    assert mean_g.shape == (groups, batch, latent_dim)
    assert logvar_g.shape == (groups, batch, latent_dim)
    for i in range(groups):
        ref_mean, ref_logvar = encoder_reference(x_groups[i], params)
        assert jnp.allclose(mean_g[i], ref_mean, atol=1e-4, rtol=1e-4)
        assert jnp.allclose(logvar_g[i], ref_logvar, atol=1e-4, rtol=1e-4)

    # Single-batch path (original module forward signature).
    mean_s, logvar_s = encoder_forward(x_groups[0], packed, latent_dim)
    jax.block_until_ready((mean_s, logvar_s))
    ref_mean, ref_logvar = encoder_reference(x_groups[0], params)
    assert mean_s.shape == (batch, latent_dim)
    assert logvar_s.shape == (batch, latent_dim)
    assert jnp.allclose(mean_s, ref_mean, atol=1e-4, rtol=1e-4)
    assert jnp.allclose(logvar_s, ref_logvar, atol=1e-4, rtol=1e-4)

    print("KERNEL_OK")
</pallas_src>

<mosaic_0001>
module attributes {stable_mosaic.version = 11 : i64} {
  func.func @encoder_kernel(%arg0: i32, %arg1: memref<1x8x32xf32, #tpu.memory_space<vmem>>, %arg2: memref<32x128xf32, #tpu.memory_space<vmem>>, %arg3: memref<4x256xf32, #tpu.memory_space<vmem>>, %arg4: memref<128x256xf32, #tpu.memory_space<vmem>>, %arg5: memref<1x8x128xf32, #tpu.memory_space<vmem>>, %arg6: memref<1x8x128xf32, #tpu.memory_space<vmem>>) attributes {dimension_semantics = [#tpu.dimension_semantics<parallel>], iteration_bounds = array<i64: 4>, scalar_prefetch = 0 : i64, scratch_operands = 0 : i64, tpu.core_type = #tpu.core_type<tc>, window_params = [{transform_indices = @transform_0, window_bounds = array<i64: 1, 8, 32>}, {pipeline_mode = #tpu.pipeline_mode<synchronous>, transform_indices = @transform_1, window_bounds = array<i64: 32, 128>}, {pipeline_mode = #tpu.pipeline_mode<synchronous>, transform_indices = @transform_2, window_bounds = array<i64: 4, 256>}, {pipeline_mode = #tpu.pipeline_mode<synchronous>, transform_indices = @transform_3, window_bounds = array<i64: 128, 256>}, {transform_indices = @transform_4, window_bounds = array<i64: 1, 8, 128>}, {transform_indices = @transform_5, window_bounds = array<i64: 1, 8, 128>}]} {
    %c0 = arith.constant 0 : index
    %c0_0 = arith.constant 0 : index
    %c0_1 = arith.constant 0 : index
    %0 = vector.load %arg1[%c0, %c0_0, %c0_1] : memref<1x8x32xf32, #tpu.memory_space<vmem>>, vector<1x8x32xf32>
    %1 = vector.shape_cast %0 : vector<1x8x32xf32> to vector<8x32xf32>
    %c0_2 = arith.constant 0 : index
    %c0_3 = arith.constant 0 : index
    %2 = vector.load %arg3[%c0_2, %c0_3] : memref<4x256xf32, #tpu.memory_space<vmem>>, vector<1x128xf32>
    %c1 = arith.constant 1 : index
    %c0_4 = arith.constant 0 : index
    %3 = vector.load %arg3[%c1, %c0_4] : memref<4x256xf32, #tpu.memory_space<vmem>>, vector<1x128xf32>
    %c2 = arith.constant 2 : index
    %c0_5 = arith.constant 0 : index
    %4 = vector.load %arg3[%c2, %c0_5] : memref<4x256xf32, #tpu.memory_space<vmem>>, vector<1x128xf32>
    %c3 = arith.constant 3 : index
    %c0_6 = arith.constant 0 : index
    %5 = vector.load %arg3[%c3, %c0_6] : memref<4x256xf32, #tpu.memory_space<vmem>>, vector<1x256xf32>
    %c0_7 = arith.constant 0 : index
    %c0_8 = arith.constant 0 : index
    %6 = vector.load %arg2[%c0_7, %c0_8] : memref<32x128xf32, #tpu.memory_space<vmem>>, vector<32x128xf32>
    %cst = arith.constant dense<0.000000e+00> : vector<8x128xf32>
    %7 = tpu.matmul %1, %6, %cst {dimension_numbers = #tpu.dot_dimension_numbers<[1], [0], [0], [1], [0, 0, 1, 1], [], []>} : vector<8x32xf32>, vector<32x128xf32>, vector<8x128xf32> -> vector<8x128xf32>
    %8 = vector.broadcast %2 : vector<1x128xf32> to vector<8x128xf32>
    %9 = arith.addf %7, %8 : vector<8x128xf32>
    %10 = math.tanh %9 : vector<8x128xf32>
    %cst_9 = arith.constant dense<0.000000e+00> : vector<128xf32>
    %11 = vector.multi_reduction <add>, %10, %cst_9 [0] : vector<8x128xf32> to vector<128xf32>
    %12 = vector.shape_cast %11 : vector<128xf32> to vector<1x128xf32>
    %cst_10 = arith.constant 8.000000e+00 : f32
    %13 = vector.broadcast %cst_10 : f32 to vector<1x128xf32>
    %14 = arith.divf %12, %13 : vector<1x128xf32>
    %15 = arith.mulf %10, %10 : vector<8x128xf32>
    %cst_11 = arith.constant dense<0.000000e+00> : vector<128xf32>
    %16 = vector.multi_reduction <add>, %15, %cst_11 [0] : vector<8x128xf32> to vector<128xf32>
    %17 = vector.shape_cast %16 : vector<128xf32> to vector<1x128xf32>
    %cst_12 = arith.constant 8.000000e+00 : f32
    %18 = vector.broadcast %cst_12 : f32 to vector<1x128xf32>
    %19 = arith.divf %17, %18 : vector<1x128xf32>
    %20 = arith.mulf %14, %14 : vector<1x128xf32>
    %21 = arith.subf %19, %20 : vector<1x128xf32>
    %cst_13 = arith.constant 8.000000e-01 : f32
    %22 = vector.broadcast %cst_13 : f32 to vector<1x128xf32>
    %23 = arith.addf %21, %22 : vector<1x128xf32>
    %24 = math.rsqrt %23 : vector<1x128xf32>
    %25 = arith.mulf %3, %24 : vector<1x128xf32>
    %26 = arith.mulf %14, %25 : vector<1x128xf32>
    %27 = arith.subf %4, %26 : vector<1x128xf32>
    %28 = vector.broadcast %25 : vector<1x128xf32> to vector<8x128xf32>
    %29 = arith.mulf %10, %28 : vector<8x128xf32>
    %30 = vector.broadcast %27 : vector<1x128xf32> to vector<8x128xf32>
    %31 = arith.addf %29, %30 : vector<8x128xf32>
    %c0_14 = arith.constant 0 : index
    %c0_15 = arith.constant 0 : index
    %32 = vector.load %arg4[%c0_14, %c0_15] : memref<128x256xf32, #tpu.memory_space<vmem>>, vector<128x256xf32>
    %cst_16 = arith.constant dense<0.000000e+00> : vector<8x256xf32>
    %33 = tpu.matmul %31, %32, %cst_16 {dimension_numbers = #tpu.dot_dimension_numbers<[1], [0], [0], [1], [0, 0, 1, 1], [], []>} : vector<8x128xf32>, vector<128x256xf32>, vector<8x256xf32> -> vector<8x256xf32>
    %34 = vector.broadcast %5 : vector<1x256xf32> to vector<8x256xf32>
    %35 = arith.addf %33, %34 : vector<8x256xf32>
    %36 = vector.extract_strided_slice %35 {offsets = [0, 0], sizes = [8, 128], strides = [1, 1]} : vector<8x256xf32> to vector<8x128xf32>
    %c0_17 = arith.constant 0 : index
    %c0_18 = arith.constant 0 : index
    %c0_19 = arith.constant 0 : index
    %37 = vector.load %arg5[%c0_17, %c0_18, %c0_19] : memref<1x8x128xf32, #tpu.memory_space<vmem>>, vector<1x8x128xf32>
    %38 = vector.shape_cast %37 : vector<1x8x128xf32> to vector<8x128xf32>
    %39 = vector.shape_cast %36 : vector<8x128xf32> to vector<1x8x128xf32>
    tpu.vector_store %arg5[%c0_17, %c0_18, %c0_19], %39 {strides = array<i32>} : memref<1x8x128xf32, #tpu.memory_space<vmem>>, vector<1x8x128xf32>,
    %40 = vector.extract_strided_slice %35 {offsets = [0, 128], sizes = [8, 128], strides = [1, 1]} : vector<8x256xf32> to vector<8x128xf32>
    %c0_20 = arith.constant 0 : index
    %c0_21 = arith.constant 0 : index
    %c0_22 = arith.constant 0 : index
    %41 = vector.load %arg6[%c0_20, %c0_21, %c0_22] : memref<1x8x128xf32, #tpu.memory_space<vmem>>, vector<1x8x128xf32>
    %42 = vector.shape_cast %41 : vector<1x8x128xf32> to vector<8x128xf32>
    %43 = vector.shape_cast %40 : vector<8x128xf32> to vector<1x8x128xf32>
    tpu.vector_store %arg6[%c0_20, %c0_21, %c0_22], %43 {strides = array<i32>} : memref<1x8x128xf32, #tpu.memory_space<vmem>>, vector<1x8x128xf32>,
    return
  }
  func.func @transform_0(%arg0: i32) -> (i32, i32, i32) {
    %c0_i32 = arith.constant 0 : i32
    %c0_i32_0 = arith.constant 0 : i32
    %c0_i32_1 = arith.constant 0 : i32
    return %arg0, %c0_i32, %c0_i32_0 : i32, i32, i32
  }
  func.func @transform_1(%arg0: i32) -> (i32, i32) {
    %c0_i32 = arith.constant 0 : i32
    %c0_i32_0 = arith.constant 0 : i32
    %c0_i32_1 = arith.constant 0 : i32
    return %c0_i32, %c0_i32_0 : i32, i32
  }
  func.func @transform_2(%arg0: i32) -> (i32, i32) {
    %c0_i32 = arith.constant 0 : i32
    %c0_i32_0 = arith.constant 0 : i32
    %c0_i32_1 = arith.constant 0 : i32
    return %c0_i32, %c0_i32_0 : i32, i32
  }
  func.func @transform_3(%arg0: i32) -> (i32, i32) {
    %c0_i32 = arith.constant 0 : i32
    %c0_i32_0 = arith.constant 0 : i32
    %c0_i32_1 = arith.constant 0 : i32
    return %c0_i32, %c0_i32_0 : i32, i32
  }
  func.func @transform_4(%arg0: i32) -> (i32, i32, i32) {
    %c0_i32 = arith.constant 0 : i32
    %c0_i32_0 = arith.constant 0 : i32
    %c0_i32_1 = arith.constant 0 : i32
    return %arg0, %c0_i32, %c0_i32_0 : i32, i32, i32
  }
  func.func @transform_5(%arg0: i32) -> (i32, i32, i32) {
    %c0_i32 = arith.constant 0 : i32
    %c0_i32_0 = arith.constant 0 : i32
    %c0_i32_1 = arith.constant 0 : i32
    return %arg0, %c0_i32, %c0_i32_0 : i32, i32, i32
  }
}

</mosaic_0001>

<bundles_post_ra>
// kernel: tpu_custom_call.1
= control target key start
LH: loop header
LB: loop body
LE: loop exit
PB: predicated region body
PF: predicated region fallthrough
CT: control target
= control target key end

     0   :  { %11 = vsyncpa [#allocation3], 0  ;;  %s1183_s0 = inlined_call_operand.hbm [shape: f32[4,8,32], index: 0, kind: input, shape index: {}]   ;;  %s1184_s1 = inlined_call_operand.hbm [shape: f32[32,128], index: 1, kind: input, shape index: {}]   ;;  %s1185_s2 = inlined_call_operand.hbm [shape: f32[4,256], index: 2, kind: input, shape index: {}]   ;;  %s1186_s3 = inlined_call_operand.hbm [shape: f32[128,256], index: 3, kind: input, shape index: {}]   ;;  %s1187_s4 = inlined_call_operand.hbm [shape: f32[4,8,128], index: 4, kind: output, shape index: {0}]   ;;  %s1188_s5 = inlined_call_operand.hbm [shape: f32[4,8,128], index: 5, kind: output, shape index: {1}]  }
   0x1   :  { %13 = vsyncpa [#allocation3 + $0x1], 0 }
   0x2   :  { %14 = vsyncpa [#allocation6], 0 }
   0x3   :  { %15 = vsyncpa [#allocation9], 0 }
   0x4   :  { %16 = vsyncpa [#allocation4], 0 }
   0x5   :  { %18 = vsyncpa [#allocation4 + $0x1], 0 }
   0x6   :  { %19 = vsyncpa [#allocation12], 0 }
   0x7   :  { %21 = vsyncpa [#allocation12 + $0x1], 0  ;;  %s1007_s18 = smov 0   ;;  %s1009_s19 = smov 0  }
   0x8   :  { %s1011_s20 = smov 0   ;;  %s1013_s21 = smov 0  }
   0x9 LB: > { %s184_s24 = sshll.u32 %s1184_s1, 4  ;;  %s1031_s25 = sadd.s32 4294967295, %s967_s21   ;;  %s967_s21 = sphi %s1013_s21, %s1198_s21   ;;  %s963_s20 = sphi %s1011_s20, %s1197_s20   ;;  %s959_s19 = sphi %s1009_s19, %s1196_s19   ;;  %s955_s18 = sphi %s1007_s18, %s1195_s18   ;;  %s185_s24 = int_to_ptr.hbm [resolvable:$true] %s184_s24 }
   0xa   : > { %p626_p0 = scmp.ge.s32.totalorder %s967_s21, 1  ;;  %p48_p1 = scmp.eq.s32.totalorder %s1031_s25, 0 }
   0xb   : > { %p173_p2 = scmp.lt.s32.totalorder %s967_s21, 5  ;;  %s969_s27 = smov [#allocation5]  }
   0xc   : > { %s186_s28 = sshll.u32 %s969_s27, 4  ;;  %s199_s6 = sshll.u32 %s1185_s2, 4  ;;  %s187_s28 = int_to_ptr.vmem [resolvable:$true] %s186_s28  ;;  %s200_s6 = int_to_ptr.hbm [resolvable:$true] %s199_s6 }
   0xd   : > { %p1036_p3 = pnand %p626_p0, %p173_p2  ;;  %s210_s10 = sshll.u32 %s1186_s3, 4  ;;  %s211_s10 = int_to_ptr.hbm [resolvable:$true] %s210_s10 }
   0xe   : > { %s970_s11 = smov [#allocation7]   ;;  %s971_s13 = smov 128  }
   0xf   : > { %p665_p4 = pneg %p1036_p3  ;;  %s201_s12 = sshll.u32 %s970_s11, 4  ;;  %s202_s12 = int_to_ptr.vmem [resolvable:$true] %s201_s12 }
  0x10   : > { %s972_s14 = smov 8   ;;  %s973_s15 = smov [#allocation8]  }
  0x11   : > { %p1047_p5 = pnand %p665_p4, %p48_p1  ;;  %s212_s16 = sshll.u32 %s973_s15, 4  ;;  %s213_s16 = int_to_ptr.vmem [resolvable:$true] %s212_s16 }
  0x12   : > { %s974_s17 = smov 256   ;;  %s975_s22 = smov 16  }
  0x13   : > { %668 = dma.hbm_to_vmem [thread:$0]  (!%p1047_p5), %s185_s24, 512, %s187_s28, [#allocation6], %s971_s13, %s971_s13, %s972_s14  }
  0x14   : > { %671 = dma.hbm_to_vmem [thread:$0]  (!%p1047_p5), %s200_s6, 128, %s202_s12, [#allocation6]  }
  0x15   : > { %674 = dma.hbm_to_vmem [thread:$0]  (!%p1047_p5), %s211_s10, 4096, %s213_s16, [#allocation9], %s974_s17, %s974_s17, %s975_s22  }
  0x16   : > { %s625_s23 = sadd.s32 4294967294, %s967_s21   ;;  %s1062_s24 = sadd.s32 1, %s967_s21  }
  0x17   : > { %s34_s27 = sadd.s32 1, %s963_s20  ;;  %s31_s28 = ssub.s32 %s967_s21, %s1062_s24 }
  0x18   : > { %p41_p6 = scmp.ne.s32.totalorder %s963_s20, %s959_s19  ;;  %p32_p7 = scmp.eq.s32.totalorder %s31_s28, 0 }
  0x19   : > { %p42_p8 = scmp.eq.s32.totalorder %s967_s21, 0  ;;  %p47_p9 = scmp.ne.s32.totalorder %s959_s19, %s955_s18 }
  0x1a   : > { %p134_p10 = scmp.eq.s32.totalorder %s1031_s25, 3  ;;  %p140_p13 = scmp.eq.s32.totalorder %s625_s23, 3 }
  0x1b   : > { %s1074_s29 = scalar_select %p32_p7, %s963_s20, %s34_s27  }
  0x1c   : > { %p1078_p11 = por %p48_p1, %p47_p9  ;;  %p1082_p12 = por %p134_p10, %p41_p6 }
  0x1d   : > { %p43_p0 = por %p42_p8, %p41_p6  ;;  %s226_s7 = sand.u32 1, %s963_s20  }
  0x1e   : > { %p1087_p2 = por %p140_p13, %p47_p9  ;;  %p689_p4 = scmp.lt.s32.totalorder %s967_s21, 4 }
  0x1f   : > { %s631_s9 = sshll.u32 %s226_s7, 3  ;;  %s632_s10 = sshll.u32 %s967_s21, 3 }
  0x20   : > { %s234_s13 = scalar_lea.hbm %s1183_s0, %s632_s10  ;;  %s230_s15 = scalar_lea.vmem [#allocation2], %s631_s9 }
  0x21   : > { %s236_s14 = sshll.u32 %s234_s13, 4  ;;  %s238_s16 = sshll.u32 %s230_s15, 4  ;;  %s237_s14 = int_to_ptr.hbm [resolvable:$true] %s236_s14  ;;  %s239_s16 = int_to_ptr.vmem [resolvable:$true] %s238_s16 }
  0x22   : > { %p1096_p5 = pnand %p689_p4, %p43_p0  ;;  %s227_s22 = scalar_lea.sflag [#allocation3], %s226_s7 }
  0x23   : > { %s831_s23 = sshra.s32 %s237_s14, 4  ;;  %s838_s9 = scalar_lea.hbm %s1183_s0, 32  ;;  %s832_s23 = int_to_ptr.hbm [resolvable:$true] %s831_s23 }
  0x24   : > { %s833_s27 = scalar_lea.hbm %s832_s23, 8  ;;  %p835_p7 = pneg %p1096_p5 }
  0x25   : > { %p834_p6 = scmp.ne.s32.totalorder %s832_s23, %s833_s27  ;;  %p839_p10 = scmp.lt.s32.totalorder %s832_s23, %s1183_s0 }
  0x26   : > { %p840_p13 = scmp.lt.s32.totalorder %s838_s9, %s833_s27 }
  0x27   : > { %p836_p8 = pnand %p835_p7, %p834_p6 }
  0x28   : > { %p841_p0 = por %p840_p13, %p839_p10 }
  0x29   : > { %p837_p9 = pneg %p836_p8 }
  0x2b   : > { %p842_p4 = pnand %p841_p0, %p837_p9 }
  0x2d   : > { %845 = shalt.err (!%p842_p4)
}
  0x2e   : > { %678 = dma.hbm_to_vmem [thread:$0]  (!%p1096_p5), %s237_s14, 128, %s239_s16, %s227_s22  }
  0x2f   : > { %247 = sbr.rel (%p1036_p3) target bundleno = 391 (0x187), region = 36  ;;  %s1113_s7 = sand.u32 (!%p1036_p3), 1, %s959_s19  }
  0x30   : > { %s1116_s13 = sshll.u32 (!%p1036_p3), %s1113_s7, 3  ;;  %s250_s15 = scalar_lea.sflag (!%p1036_p3), [#allocation3], %s1113_s7 }
  0x31   : > { %s253_s23 = scalar_lea.vmem (!%p1036_p3), [#allocation2], %s1116_s13 }
  0x34   : > { %934 = dma.done.wait (%p1078_p11), %s250_s15, 128  }
  0x35   : > { %936 = vsyncadd (%p1078_p11), %s250_s15, 4294967168 }
  0x36   : > { %938 = dma.done.wait (%p48_p1), [#allocation6], 640  }
  0x37   : > { %940 = vsyncadd (%p48_p1), [#allocation6], 4294966656 }
  0x38   : > { %942 = dma.done.wait (%p48_p1), [#allocation9], 4096  }
  0x39   : > { %944 = vsyncadd (%p48_p1), [#allocation9], 4294963200  ;;  %v310_v0 = vld [vmem:[#allocation5 + $0x18] sm:$0xff]  ;;  %v309_v1 = vld [vmem:[#allocation5 + $0x10] sm:$0xff]  ;;  %vm312_vm0 = vcmask 261120   ;;  %v976_v31 = vmov 8.0  }
  0x3a   : > { %328 = vmatpush.msra.mxu0 %v310_v0  ;;  %v308_v2 = vld [vmem:[#allocation5 + $0x8] sm:$0xff]  ;;  %v307_v3 = vld [vmem:[#allocation5] sm:$0xff]  ;;  %v301_v4 = vld [vmem:[%s253_s23] sm:$0xff]  ;;  %735 = vrcp.f32 %v976_v31  ;;  %s643_s26 = sshll.u32 %s1031_s25, 3  ;;  %s293_s17 = scalar_lea.vmem [#allocation10], %s1116_s13 }
  0x3b   : > { %v409_v5 = vld [vmem:[#allocation8 + $0xf0] sm:$0xff]  ;;  %v410_v6 = vld [vmem:[#allocation8 + $0xf8] sm:$0xff]  ;;  %v407_v7 = vld [vmem:[#allocation8 + $0xe0] sm:$0xff]  ;;  %s474_s16 = scalar_lea.hbm %s1187_s4, %s643_s26  ;;  %s476_s22 = sshll.u32 %s293_s17, 4  ;;  %s477_s22 = int_to_ptr.vmem [resolvable:$true] %s476_s22 }
  0x3c   : > { %329 = vmatpush.msra.mxu0 %v309_v1  ;;  %416 = vmatpush.msra.mxu1 %v409_v5  ;;  %v408_v8 = vld [vmem:[#allocation8 + $0xe8] sm:$0xff]  ;;  %v405_v9 = vld [vmem:[#allocation8 + $0xd0] sm:$0xff]  ;;  %v406_v10 = vld [vmem:[#allocation8 + $0xd8] sm:$0xff]  ;;  %s478_s27 = sshll.u32 %s474_s16, 4  ;;  %s488_s9 = scalar_lea.hbm %s1188_s5, %s643_s26  ;;  %s479_s27 = int_to_ptr.hbm [resolvable:$true] %s478_s27 }
  0x3d   : > { %436 = vmatpush.msra.mxu2 %v410_v6  ;;  %v403_v11 = vld [vmem:[#allocation8 + $0xc0] sm:$0xff]  ;;  %v404_v12 = vld [vmem:[#allocation8 + $0xc8] sm:$0xff]  ;;  %v401_v13 = vld [vmem:[#allocation8 + $0xb0] sm:$0xff]  ;;  %s300_s25 = scalar_lea.vmem [#allocation11], %s1116_s13  ;;  %s492_s12 = sshll.u32 %s488_s9, 4  ;;  %s493_s12 = int_to_ptr.hbm [resolvable:$true] %s492_s12 }
  0x3e   : > { %330 = vmatpush.msra.mxu0 %v308_v2  ;;  %417 = vmatpush.msra.mxu1 %v407_v7  ;;  %v402_v14 = vld [vmem:[#allocation8 + $0xb8] sm:$0xff]  ;;  %v399_v15 = vld [vmem:[#allocation8 + $0xa0] sm:$0xff]  ;;  %v400_v16 = vld [vmem:[#allocation8 + $0xa8] sm:$0xff]  ;;  %s1141_s11 = sshll.u32 %s300_s25, 4  ;;  %s459_s15 = scalar_lea.sflag [#allocation4], %s1113_s7  ;;  %s491_s11 = int_to_ptr.vmem [resolvable:$true] %s1141_s11 }
  0x3f   : > { %437 = vmatpush.msra.mxu2 %v408_v8  ;;  %v397_v17 = vld [vmem:[#allocation8 + $0x90] sm:$0xff]  ;;  %v398_v18 = vld [vmem:[#allocation8 + $0x98] sm:$0xff]  ;;  %v395_v19 = vld [vmem:[#allocation8 + $0x80] sm:$0xff]  ;;  %s875_s23 = sshra.s32 %s479_s27, 4  ;;  %s881_s26 = scalar_lea.hbm %s1187_s4, 32  ;;  %s876_s23 = int_to_ptr.hbm [resolvable:$true] %s875_s23 }
  0x40   : > { %331 = vmatpush.msra.mxu0 %v307_v3  ;;  %418 = vmatpush.msra.mxu1 %v405_v9  ;;  %v396_v20 = vld [vmem:[#allocation8 + $0x88] sm:$0xff]  ;;  %v393_v21 = vld [vmem:[#allocation8 + $0x70] sm:$0xff]  ;;  %v394_v22 = vld [vmem:[#allocation8 + $0x78] sm:$0xff]  ;;  %v736_v39 = vpop.eup %735  ;;  %s877_s30 = scalar_lea.hbm %s876_s23, 8  ;;  %p882_p5 = scmp.lt.s32.totalorder %s876_s23, %s1187_s4 }
  0x41   : > { %640 = vmatmul.msk.f32.vlgmr.msra.gmra.mxu0 %vm312_vm0, %v301_v4  ;;  %438 = vmatpush.msra.mxu2 %v406_v10  ;;  %v391_v23 = vld [vmem:[#allocation8 + $0x60] sm:$0xff]  ;;  %v392_v24 = vld [vmem:[#allocation8 + $0x68] sm:$0xff]  ;;  %v389_v25 = vld [vmem:[#allocation8 + $0x50] sm:$0xff]  ;;  %v344_v42 = vmul.f32 8.0, %v736_v39  ;;  %vm348_vm1 = vweird.f32 %v736_v39  ;;  %p878_p1 = scmp.ne.s32.totalorder %s876_s23, %s877_s30  ;;  %p883_p6 = scmp.lt.s32.totalorder %s881_s26, %s877_s30 }
  0x42   : > { %419 = vmatpush.msra.mxu1 %v403_v11  ;;  %v390_v26 = vld [vmem:[#allocation8 + $0x58] sm:$0xff]  ;;  %v387_v27 = vld [vmem:[#allocation8 + $0x40] sm:$0xff]  ;;  %v388_v28 = vld [vmem:[#allocation8 + $0x48] sm:$0xff] }
  0x43   : > { %439 = vmatpush.msra.mxu2 %v404_v12  ;;  %v385_v29 = vld [vmem:[#allocation8 + $0x30] sm:$0xff]  ;;  %v386_v30 = vld [vmem:[#allocation8 + $0x38] sm:$0xff]  ;;  %v383_v32 = vld [vmem:[#allocation8 + $0x20] sm:$0xff]  ;;  %v345_v43 = vsub.f32 1.0, %v344_v42  ;;  %p879_p3 = pnand %p878_p1, %p1082_p12  ;;  %p884_p7 = por %p883_p6, %p882_p5 }
  0x44   : > { %420 = vmatpush.msra.mxu1 %v401_v13  ;;  %v384_v33 = vld [vmem:[#allocation8 + $0x28] sm:$0xff]  ;;  %v734_v34 = vld [vmem:[#allocation7] ss:$0 sm:$0xff]  ;;  %v381_v35 = vld [vmem:[#allocation8 + $0x10] sm:$0xff] }
  0x45   : > { %440 = vmatpush.msra.mxu2 %v402_v14  ;;  %v382_v36 = vld [vmem:[#allocation8 + $0x18] sm:$0xff]  ;;  %v379_v37 = vld [vmem:[#allocation8] sm:$0xff]  ;;  %v380_v38 = vld [vmem:[#allocation8 + $0x8] sm:$0xff]  ;;  %v346_v47 = vmul.f32 %v736_v39, %v345_v43  ;;  %p880_p11 = pneg %p879_p3 }
  0x46   : > { %421 = vmatpush.msra.mxu1 %v399_v15  ;;  %v303_v7 = vld [vmem:[#allocation7 + $0x1] sm:$0x1]  ;;  %v304_v11 = vld [vmem:[#allocation7 + $0x2] sm:$0x1] }
  0x47   : > { %441 = vmatpush.msra.mxu2 %v400_v16  ;;  %v347_v52 = vadd.f32 %v736_v39, %v346_v47  ;;  %p885_p8 = pnand %p884_p7, %p880_p11 }
  0x48   : > { %422 = vmatpush.msra.mxu1 %v397_v17 }
  0x49   : > { %442 = vmatpush.msra.mxu2 %v398_v18  ;;  %v349_v57 = vsel %vm348_vm1, %v736_v39, %v347_v52  ;;  %v306_v18 = vld [vmem:[#allocation7 + $0x3] ss:$4 sm:$0x3] }
  0x4a   : > { %423 = vmatpush.msra.mxu1 %v395_v19  ;;  %v412_v19 = vperm.slane %v306_v18, 0 }
  0x4b   : > { %443 = vmatpush.msra.mxu2 %v396_v20 }
  0x4c   : > { %424 = vmatpush.msra.mxu1 %v393_v21 }
  0x4d   : > { %444 = vmatpush.msra.mxu2 %v394_v22  ;;  %v413_v22 = vperm.slane %v306_v18, 1 }
  0x4e   : > { %425 = vmatpush.msra.mxu1 %v391_v23 }
  0x4f   : > { %445 = vmatpush.msra.mxu2 %v392_v24 }
  0x50   : > { %426 = vmatpush.msra.mxu1 %v389_v25 }
  0x51   : > { %446 = vmatpush.msra.mxu2 %v390_v26 }
  0x52   : > { %427 = vmatpush.msra.mxu1 %v387_v27 }
  0x53   : > { %447 = vmatpush.msra.mxu2 %v388_v28 }
  0x54   : > { %428 = vmatpush.msra.mxu1 %v385_v29 }
  0x55   : > { %448 = vmatpush.msra.mxu2 %v386_v30 }
  0x56   : > { %429 = vmatpush.msra.mxu1 %v383_v32 }
  0x57   : > { %449 = vmatpush.msra.mxu2 %v384_v33 }
  0x58   : > { %430 = vmatpush.msra.mxu1 %v381_v35 }
  0x59   : > { %450 = vmatpush.msra.mxu2 %v382_v36 }
  0x5a   : > { %431 = vmatpush.msra.mxu1 %v379_v37 }
  0x5b   : > { %451 = vmatpush.msra.mxu2 %v380_v38 }
  0xbe   : > { %v333_v40 = vpop.f32.mrf.mxu0 }
  0xbf   : > { %v334_v41 = vadd.f32 %v734_v34, %v333_v40 }
  0xc1   : > { %737 = vtanh.f32 %v334_v41 }
  0xc7   : > { %v738_v44 = vpop.eup %737 }
  0xc8   : > { %v337_v45 = vrot.slane %v738_v44, 4  ;;  %v351_v46 = vmul.f32 %v738_v44, %v738_v44 }
  0xca   : > { %v338_v48 = vadd.f32 %v738_v44, %v337_v45  ;;  %v352_v49 = vrot.slane %v351_v46, 4 }
  0xcc   : > { %v339_v50 = vrot.slane %v338_v48, 2  ;;  %v353_v51 = vadd.f32 %v352_v49, %v351_v46 }
  0xce   : > { %v340_v53 = vadd.f32 %v339_v50, %v338_v48  ;;  %v354_v54 = vrot.slane %v353_v51, 2 }
  0xd0   : > { %v341_v55 = vrot.slane %v340_v53, 1  ;;  %v355_v56 = vadd.f32 %v354_v54, %v353_v51 }
  0xd2   : > { %v342_v58 = vadd.f32 %v341_v55, %v340_v53  ;;  %v356_v59 = vrot.slane %v355_v56, 1 }
  0xd4   : > { %v350_v60 = vmul.f32 %v349_v57, %v342_v58  ;;  %v357_v61 = vadd.f32 %v356_v59, %v355_v56 }
  0xd6   : > { %v358_v62 = vmul.f32 %v357_v61, %v349_v57  ;;  %v359_v63 = vmul.f32 %v350_v60, %v350_v60 }
  0xd8   : > { %v360_v0 = vsub.f32 %v358_v62, %v359_v63 }
  0xda   : > { %v361_v1 = vadd.f32 0.8, %v360_v0 }
  0xdc   : > { %739 = vrsqrt.f32 %v361_v1  ;;  %vm368_vm3 = vweird.f32 %v361_v1 }
  0xe2   : > { %v740_v2 = vpop.eup %739 }
  0xe3   : > { %v363_v3 = vmul.f32 %v740_v2, %v361_v1  ;;  %vm369_vm2 = vweird.f32 %v740_v2 }
  0xe4   : > { %vm370_vm4 = vmor %vm368_vm3, %vm369_vm2 }
  0xe5   : > { %v364_v4 = vmul.f32 %v740_v2, %v363_v3 }
  0xe7   : > { %v365_v5 = vmul.f32 0.5, %v364_v4 }
  0xe9   : > { %v366_v6 = vsub.f32 1.5, %v365_v5 }
  0xeb   : > { %v367_v8 = vmul.f32 %v740_v2, %v366_v6 }
  0xed   : > { %v371_v9 = vsel %vm370_vm4, %v740_v2, %v367_v8 }
  0xee   : > { %v372_v10 = vmul.f32 %v371_v9, %v303_v7 }
  0xf0   : > { %v373_v12 = vmul.f32 %v372_v10, %v350_v60  ;;  %v375_v13 = vperm.slane %v372_v10, 0 }
  0xf2   : > { %v374_v14 = vsub.f32 %v304_v11, %v373_v12  ;;  %v376_v15 = vmul.f32 %v738_v44, %v375_v13 }
  0xf4   : > { %v377_v16 = vperm.slane %v374_v14, 0 }
  0xf6   : > { %v378_v17 = vadd.f32 %v377_v16, %v376_v15 }
  0xf8   : > { %432 = vmatmul.f32.vlgmr.msra.gmra.mxu1 %v378_v17  ;;  %452 = vmatmul.f32.vlgmr.msra.gmra.mxu2 %v378_v17 }
 0x175   : > { %v433_v20 = vpop.f32.mrf.mxu1 }
 0x176   : > { %v434_v21 = vadd.f32 %v433_v20, %v412_v19 }
 0x178   : > { %456 = vst [vmem:[%s293_s17] sm:$0xff] %v434_v21 }
 0x179   : > { %888 = shalt.err (!%p885_p8)
}
 0x17a   : > { %661 = dma.vmem_to_hbm [thread:$0]  (%p1082_p12), %s477_s22, 128, %s479_s27, %s459_s15  }
 0x17b   : > { %v453_v23 = vpop.f32.mrf.mxu2  ;;  %s464_s13 = scalar_lea.sflag [#allocation12], %s1113_s7  ;;  %s903_s17 = sshra.s32 %s493_s12, 4  ;;  %s904_s17 = int_to_ptr.hbm [resolvable:$true] %s903_s17 }
 0x17c   : > { %v454_v24 = vadd.f32 %v453_v23, %v413_v22  ;;  %s905_s9 = scalar_lea.hbm %s904_s17, 8  ;;  %s909_s14 = scalar_lea.hbm %s1188_s5, 32 }
 0x17d   : > { %p906_p9 = scmp.ne.s32.totalorder %s904_s17, %s905_s9  ;;  %p910_p0 = scmp.lt.s32.totalorder %s904_s17, %s1188_s5 }
 0x17e   : > { %457 = vst [vmem:[%s300_s25] sm:$0xff] %v454_v24  ;;  %p911_p4 = scmp.lt.s32.totalorder %s909_s14, %s905_s9 }
 0x17f   : > { %p907_p10 = pnand %p906_p9, %p1082_p12 }
 0x180   : > { %p912_p1 = por %p911_p4, %p910_p0 }
 0x181   : > { %p908_p13 = pneg %p907_p10 }
 0x183   : > { %p913_p3 = pnand %p912_p1, %p908_p13 }
 0x185   : > { %916 = shalt.err (!%p913_p3)
}
 0x186   : > { %662 = dma.vmem_to_hbm [thread:$0]  (%p1082_p12), %s491_s11, 128, %s493_s12, %s464_s13  }
 0x187 PF: > { %p693_p11 = scmp.ge.s32.totalorder %s967_s21, 2  ;;  %s504_s7 = sand.u32 1, %s955_s18  }
 0x188   : > { %s505_s22 = scalar_lea.sflag [#allocation4], %s504_s7 }
 0x189   : > { %p680_p5 = pnand %p693_p11, %p1087_p2 }
 0x18b   : > { %p681_p6 = pneg %p680_p5 }
 0x18d   : > { %946 = dma.done.wait (%p681_p6), %s505_s22, 128  }
 0x18e   : > { %948 = vsyncadd (%p681_p6), %s505_s22, 4294967168  ;;  %s515_s27 = scalar_lea.sflag [#allocation12], %s504_s7 }
 0x18f   : > { %950 = dma.done.wait (%p681_p6), %s515_s27, 128  }
 0x190   : > { %952 = vsyncadd (%p681_p6), %s515_s27, 4294967168  ;;  %p24_p12 = scmp.ge.s32.totalorder %s1062_s24, 6   ;;  %s1195_s18 = smov %s959_s19 }
 0x191   : > { %s1196_s19 = smov %s963_s20  ;;  %s1197_s20 = smov %s1074_s29 }
 0x192   : > { %s1198_s21 = smov %s1062_s24  ;;  %26 = sbr.rel (!%p24_p12) target bundleno = 9 (0x9), region = 111 }
 0x197   :  { %521 = vsyncpa [#allocation3], 1 }
 0x198   :  { %523 = vsyncpa [#allocation3 + $0x1], 1 }
 0x199   :  { %524 = vsyncpa [#allocation6], 1 }
 0x19a   :  { %525 = vsyncpa [#allocation9], 1 }
 0x19b   :  { %526 = vsyncpa [#allocation4], 1 }
 0x19c   :  { %528 = vsyncpa [#allocation4 + $0x1], 1 }
 0x19d   :  { %529 = vsyncpa [#allocation12], 1 }
 0x19e   :  { %531 = vsyncpa [#allocation12 + $0x1], 1 }

</bundles_post_ra>
